<compile_context>
chip_gen: v7x
topology: tpu7x:2x2x1
jax: 0.10.0
libtpu: 0.0.40
codegen_flags: <defaults>
</compile_context>

<pallas_src>
import functools

import jax
import jax.numpy as jnp
from jax import lax
from jax.experimental import pallas as pl
from jax.experimental.pallas import tpu as pltpu

IGNORE_INDEX = -100


def _ce2d_kernel(logits_ref, targets_ref, loss_out_ref, cnt_out_ref, *,
                 ignore_index, sub_rows, num_full_chunks, rem_rows):
    """One (batch, pixel-tile) grid cell.

    logits_ref : (1, C, TR, 128)  native dtype
    targets_ref: (1, TR, 128)     int32 (padded with ignore_index)
    *_out_ref  : (1, 1, 1, 1)     f32 partial sums for this tile
    """
    num_classes = logits_ref.shape[1]

    def chunk(r0, rows):
        # `rows` is static; `r0` may be traced (multiple of sub_rows).
        t = targets_ref[0, pl.ds(r0, rows), :]                   # (rows,128) i32

        # pass 1: running max over classes (exact in the native dtype).
        m = logits_ref[0, 0, pl.ds(r0, rows), :]
        for c in range(1, num_classes):
            m = jnp.maximum(m, logits_ref[0, c, pl.ds(r0, rows), :])
        m = m.astype(jnp.float32)

        # pass 2: softmax denominator + gather of the target-class logit.
        s = jnp.zeros_like(m)
        picked = jnp.zeros_like(m)
        for c in range(num_classes):
            xc = logits_ref[0, c, pl.ds(r0, rows), :].astype(jnp.float32)
            s = s + jnp.exp(xc - m)
            picked = jnp.where(t == c, xc, picked)
        lse = jnp.log(s) + m

        valid = t != ignore_index
        # Keep the where(valid, ..., 0) structure: garbage (even NaN/Inf) from
        # OOB logits rows of a partial last tile must not leak into the sums.
        loss = jnp.where(valid, lse - picked, 0.0)
        return loss, valid.astype(jnp.float32)

    loss_s = 0.0
    cnt_s = 0.0

    if num_full_chunks > 0:
        def body(ci, carry):
            lv, cv = carry
            r0 = pl.multiple_of(ci * sub_rows, sub_rows)
            l, v = chunk(r0, sub_rows)
            return lv + l, cv + v

        zero = jnp.zeros((sub_rows, 128), jnp.float32)
        lv, cv = lax.fori_loop(0, num_full_chunks, body, (zero, zero))
        loss_s = loss_s + jnp.sum(lv)
        cnt_s = cnt_s + jnp.sum(cv)

    if rem_rows > 0:
        # Static ragged chunk when the tile is not a multiple of sub_rows
        # (only happens when the whole pixel axis fits in one block).
        l, v = chunk(num_full_chunks * sub_rows, rem_rows)
        loss_s = loss_s + jnp.sum(l)
        cnt_s = cnt_s + jnp.sum(v)

    loss_out_ref[...] = jnp.reshape(loss_s, (1, 1, 1, 1))
    cnt_out_ref[...] = jnp.reshape(cnt_s, (1, 1, 1, 1))


def _vmem_limit_bytes():
    try:
        cap = int(pltpu.get_tpu_info().vmem_capacity_bytes)
    except Exception:
        cap = 64 * 1024 * 1024            # conservative default (v7x per-core)
    # Scoped limit well under physical capacity: 64 MiB on v5e/v6e (128 MiB
    # VMEM), 32 MiB on v7x (64 MiB VMEM).
    return int(min(cap // 2, 64 * 1024 * 1024))


def _choose_rows_per_tile(num_classes, num_rows, itemsize, sub_rows, target_bytes):
    """Rows of 128 pixels per block so the logits block is ~target_bytes."""
    bytes_per_row = num_classes * 128 * itemsize
    tr = (target_bytes // bytes_per_row) // sub_rows * sub_rows
    tr = max(sub_rows, tr)
    if tr >= num_rows:
        return int(num_rows)              # whole pixel axis in one block
    return int(tr)


@jax.jit
def cross_entropy_loss_2d(logits, targets):
    """logits: (N, C, H, W) float; targets: (N, H, W) int. Scalar mean loss."""
    N, C, H, W = logits.shape
    HW = H * W
    R = HW // 128                         # full 128-pixel rows
    tail = HW - R * 128

    x_all = logits.reshape(N, C, HW)      # free reshape (contiguous dims), native dtype
    t_all = targets.reshape(N, HW).astype(jnp.int32)

    loss_sum = jnp.zeros((), jnp.float32)
    cnt_sum = jnp.zeros((), jnp.float32)

    if R > 0:
        if tail == 0:
            x = x_all.reshape(N, C, R, 128)           # free
            t = t_all.reshape(N, R, 128)
        else:
            # TODO(synk): when HW % 128 != 0 this bulk slice still costs one
            # HBM copy of the logits bulk (but avoids the full-pad copy); the
            # <128-px tail is handled by the pure-JAX epilogue below.
            x = lax.slice_in_dim(x_all, 0, R * 128, axis=2).reshape(N, C, R, 128)
            t = lax.slice_in_dim(t_all, 0, R * 128, axis=1).reshape(N, R, 128)

        itemsize = x.dtype.itemsize
        sub_rows = 8 if itemsize >= 4 else (16 if itemsize == 2 else 32)
        vmem_limit = _vmem_limit_bytes()
        target_block = min(12 * 1024 * 1024, vmem_limit // 4)
        TR = _choose_rows_per_tile(C, R, itemsize, sub_rows, target_block)
        num_inner = pl.cdiv(R, TR)
        num_full_chunks = TR // sub_rows
        rem_rows = TR % sub_rows

        # Pad only the (cheap) targets up to the tile grid; the ragged last
        # logits tile reads OOB rows whose garbage is masked by t==IGNORE.
        Rp = num_inner * TR
        if Rp != R:
            t = jnp.pad(t, ((0, 0), (0, Rp - R), (0, 0)),
                        constant_values=IGNORE_INDEX)

        kernel = functools.partial(
            _ce2d_kernel,
            ignore_index=IGNORE_INDEX,
            sub_rows=sub_rows,
            num_full_chunks=num_full_chunks,
            rem_rows=rem_rows,
        )

        loss_p, cnt_p = pl.pallas_call(
            kernel,
            out_shape=(
                jax.ShapeDtypeStruct((N, num_inner, 1, 1), jnp.float32),
                jax.ShapeDtypeStruct((N, num_inner, 1, 1), jnp.float32),
            ),
            grid_spec=pltpu.PrefetchScalarGridSpec(
                num_scalar_prefetch=0,
                grid=(N, num_inner),
                in_specs=[
                    pl.BlockSpec((1, C, TR, 128), lambda n, i: (n, 0, i, 0)),
                    pl.BlockSpec((1, TR, 128), lambda n, i: (n, i, 0)),
                ],
                out_specs=[
                    pl.BlockSpec((1, 1, 1, 1), lambda n, i: (n, i, 0, 0)),
                    pl.BlockSpec((1, 1, 1, 1), lambda n, i: (n, i, 0, 0)),
                ],
            ),
            compiler_params=pltpu.CompilerParams(
                dimension_semantics=("parallel", "parallel"),
                vmem_limit_bytes=vmem_limit,
            ),
        )(x, t)

        loss_sum = loss_sum + jnp.sum(loss_p)
        cnt_sum = cnt_sum + jnp.sum(cnt_p)

    if tail > 0:
        # <128-pixel ragged tail per image: tiny, handled in pure JAX.
        xt = lax.slice_in_dim(x_all, R * 128, HW, axis=2).astype(jnp.float32)
        tt = lax.slice_in_dim(t_all, R * 128, HW, axis=1)
        logp = jax.nn.log_softmax(xt, axis=1)
        valid = tt != IGNORE_INDEX
        t_safe = jnp.where(valid, tt, 0)
        picked = jnp.take_along_axis(logp, t_safe[:, None, :], axis=1)[:, 0]
        loss_sum = loss_sum + jnp.sum(jnp.where(valid, -picked, 0.0))
        cnt_sum = cnt_sum + jnp.sum(valid.astype(jnp.float32))

    # TODO(synk): per-class `weight` tensor not implemented (module default weight=None).
    return (loss_sum / cnt_sum).astype(jnp.float32)


def _reference(logits, targets):
    logp = jax.nn.log_softmax(logits.astype(jnp.float32), axis=1)   # (N,C,H,W)
    t = targets.astype(jnp.int32)
    valid = t != IGNORE_INDEX
    t_safe = jnp.where(valid, t, 0)
    picked = jnp.take_along_axis(logp, t_safe[:, None, :, :], axis=1)[:, 0]
    loss = jnp.where(valid, -picked, 0.0)
    return jnp.sum(loss) / jnp.sum(valid.astype(jnp.float32))


if __name__ == "__main__":
    key = jax.random.PRNGKey(0)
    k1, k2 = jax.random.split(key)

    N, C, H, W = 2, 4, 16, 16
    logits = jax.random.normal(k1, (N, C, H, W), dtype=jnp.float32)
    targets = jax.random.randint(k2, (N, H, W), 0, C, dtype=jnp.int32)
    # sprinkle a few ignore_index pixels to exercise masking
    targets = targets.at[0, 0, :4].set(IGNORE_INDEX)

    out = cross_entropy_loss_2d(logits, targets)
    out = jax.block_until_ready(out)

    ref = _reference(logits, targets)
    assert jnp.allclose(out, ref, atol=1e-5, rtol=1e-5), (out, ref)

    print("KERNEL_OK")
</pallas_src>

<mosaic_0001>
module attributes {stable_mosaic.version = 11 : i64} {
  func.func @_ce2d_kernel(%arg0: i32, %arg1: i32, %arg2: memref<1x4x2x128xf32, #tpu.memory_space<vmem>>, %arg3: memref<1x2x128xi32, #tpu.memory_space<vmem>>, %arg4: memref<1x1x1x1xf32, #tpu.memory_space<vmem>>, %arg5: memref<1x1x1x1xf32, #tpu.memory_space<vmem>>) attributes {dimension_semantics = [#tpu.dimension_semantics<parallel>, #tpu.dimension_semantics<parallel>], iteration_bounds = array<i64: 2, 1>, scalar_prefetch = 0 : i64, scratch_operands = 0 : i64, tpu.core_type = #tpu.core_type<tc>, window_params = [{transform_indices = @transform_0, window_bounds = array<i64: 1, 4, 2, 128>}, {transform_indices = @transform_1, window_bounds = array<i64: 1, 2, 128>}, {transform_indices = @transform_2, window_bounds = array<i64: 1, 1, 1, 1>}, {transform_indices = @transform_3, window_bounds = array<i64: 1, 1, 1, 1>}]} {
    %c0 = arith.constant 0 : index
    %c0_0 = arith.constant 0 : index
    %c0_1 = arith.constant 0 : index
    %0 = vector.load %arg3[%c0, %c0_0, %c0_1] : memref<1x2x128xi32, #tpu.memory_space<vmem>>, vector<1x2x128xi32>
    %1 = vector.shape_cast %0 : vector<1x2x128xi32> to vector<2x128xi32>
    %c0_2 = arith.constant 0 : index
    %c0_3 = arith.constant 0 : index
    %c0_4 = arith.constant 0 : index
    %c0_5 = arith.constant 0 : index
    %2 = vector.load %arg2[%c0_2, %c0_3, %c0_4, %c0_5] : memref<1x4x2x128xf32, #tpu.memory_space<vmem>>, vector<1x1x2x128xf32>
    %3 = vector.shape_cast %2 : vector<1x1x2x128xf32> to vector<2x128xf32>
    %c0_6 = arith.constant 0 : index
    %c1 = arith.constant 1 : index
    %c0_7 = arith.constant 0 : index
    %c0_8 = arith.constant 0 : index
    %4 = vector.load %arg2[%c0_6, %c1, %c0_7, %c0_8] : memref<1x4x2x128xf32, #tpu.memory_space<vmem>>, vector<1x1x2x128xf32>
    %5 = vector.shape_cast %4 : vector<1x1x2x128xf32> to vector<2x128xf32>
    %6 = arith.maximumf %3, %5 : vector<2x128xf32>
    %c0_9 = arith.constant 0 : index
    %c2 = arith.constant 2 : index
    %c0_10 = arith.constant 0 : index
    %c0_11 = arith.constant 0 : index
    %7 = vector.load %arg2[%c0_9, %c2, %c0_10, %c0_11] : memref<1x4x2x128xf32, #tpu.memory_space<vmem>>, vector<1x1x2x128xf32>
    %8 = vector.shape_cast %7 : vector<1x1x2x128xf32> to vector<2x128xf32>
    %9 = arith.maximumf %6, %8 : vector<2x128xf32>
    %c0_12 = arith.constant 0 : index
    %c3 = arith.constant 3 : index
    %c0_13 = arith.constant 0 : index
    %c0_14 = arith.constant 0 : index
    %10 = vector.load %arg2[%c0_12, %c3, %c0_13, %c0_14] : memref<1x4x2x128xf32, #tpu.memory_space<vmem>>, vector<1x1x2x128xf32>
    %11 = vector.shape_cast %10 : vector<1x1x2x128xf32> to vector<2x128xf32>
    %12 = arith.maximumf %9, %11 : vector<2x128xf32>
    %cst = arith.constant 0.000000e+00 : f32
    %13 = vector.broadcast %cst : f32 to vector<2x128xf32>
    %cst_15 = arith.constant 0.000000e+00 : f32
    %14 = vector.broadcast %cst_15 : f32 to vector<2x128xf32>
    %c0_16 = arith.constant 0 : index
    %c0_17 = arith.constant 0 : index
    %c0_18 = arith.constant 0 : index
    %c0_19 = arith.constant 0 : index
    %15 = vector.load %arg2[%c0_16, %c0_17, %c0_18, %c0_19] : memref<1x4x2x128xf32, #tpu.memory_space<vmem>>, vector<1x1x2x128xf32>
    %16 = vector.shape_cast %15 : vector<1x1x2x128xf32> to vector<2x128xf32>
    %17 = arith.subf %16, %12 : vector<2x128xf32>
    %18 = math.exp %17 : vector<2x128xf32>
    %19 = arith.addf %13, %18 : vector<2x128xf32>
    %c0_i32 = arith.constant 0 : i32
    %20 = vector.broadcast %c0_i32 : i32 to vector<2x128xi32>
    %21 = arith.cmpi eq, %1, %20 : vector<2x128xi32>
    %22 = arith.select %21, %16, %14 : vector<2x128xi1>, vector<2x128xf32>
    %c0_20 = arith.constant 0 : index
    %c1_21 = arith.constant 1 : index
    %c0_22 = arith.constant 0 : index
    %c0_23 = arith.constant 0 : index
    %23 = vector.load %arg2[%c0_20, %c1_21, %c0_22, %c0_23] : memref<1x4x2x128xf32, #tpu.memory_space<vmem>>, vector<1x1x2x128xf32>
    %24 = vector.shape_cast %23 : vector<1x1x2x128xf32> to vector<2x128xf32>
    %25 = arith.subf %24, %12 : vector<2x128xf32>
    %26 = math.exp %25 : vector<2x128xf32>
    %27 = arith.addf %19, %26 : vector<2x128xf32>
    %c1_i32 = arith.constant 1 : i32
    %28 = vector.broadcast %c1_i32 : i32 to vector<2x128xi32>
    %29 = arith.cmpi eq, %1, %28 : vector<2x128xi32>
    %30 = arith.select %29, %24, %22 : vector<2x128xi1>, vector<2x128xf32>
    %c0_24 = arith.constant 0 : index
    %c2_25 = arith.constant 2 : index
    %c0_26 = arith.constant 0 : index
    %c0_27 = arith.constant 0 : index
    %31 = vector.load %arg2[%c0_24, %c2_25, %c0_26, %c0_27] : memref<1x4x2x128xf32, #tpu.memory_space<vmem>>, vector<1x1x2x128xf32>
    %32 = vector.shape_cast %31 : vector<1x1x2x128xf32> to vector<2x128xf32>
    %33 = arith.subf %32, %12 : vector<2x128xf32>
    %34 = math.exp %33 : vector<2x128xf32>
    %35 = arith.addf %27, %34 : vector<2x128xf32>
    %c2_i32 = arith.constant 2 : i32
    %36 = vector.broadcast %c2_i32 : i32 to vector<2x128xi32>
    %37 = arith.cmpi eq, %1, %36 : vector<2x128xi32>
    %38 = arith.select %37, %32, %30 : vector<2x128xi1>, vector<2x128xf32>
    %c0_28 = arith.constant 0 : index
    %c3_29 = arith.constant 3 : index
    %c0_30 = arith.constant 0 : index
    %c0_31 = arith.constant 0 : index
    %39 = vector.load %arg2[%c0_28, %c3_29, %c0_30, %c0_31] : memref<1x4x2x128xf32, #tpu.memory_space<vmem>>, vector<1x1x2x128xf32>
    %40 = vector.shape_cast %39 : vector<1x1x2x128xf32> to vector<2x128xf32>
    %41 = arith.subf %40, %12 : vector<2x128xf32>
    %42 = math.exp %41 : vector<2x128xf32>
    %43 = arith.addf %35, %42 : vector<2x128xf32>
    %c3_i32 = arith.constant 3 : i32
    %44 = vector.broadcast %c3_i32 : i32 to vector<2x128xi32>
    %45 = arith.cmpi eq, %1, %44 : vector<2x128xi32>
    %46 = arith.select %45, %40, %38 : vector<2x128xi1>, vector<2x128xf32>
    %47 = math.log %43 : vector<2x128xf32>
    %48 = arith.addf %47, %12 : vector<2x128xf32>
    %c-100_i32 = arith.constant -100 : i32
    %49 = vector.broadcast %c-100_i32 : i32 to vector<2x128xi32>
    %50 = arith.cmpi ne, %1, %49 : vector<2x128xi32>
    %51 = arith.subf %48, %46 : vector<2x128xf32>
    %cst_32 = arith.constant 0.000000e+00 : f32
    %52 = vector.broadcast %cst_32 : f32 to vector<2x128xf32>
    %53 = arith.select %50, %51, %52 : vector<2x128xi1>, vector<2x128xf32>
    %54 = arith.extui %50 : vector<2x128xi1> to vector<2x128xi32>
    %55 = arith.sitofp %54 : vector<2x128xi32> to vector<2x128xf32>
    %56 = vector.shape_cast %53 : vector<2x128xf32> to vector<1x2x128xf32>
    %cst_33 = arith.constant dense<0.000000e+00> : vector<1xf32>
    %57 = vector.multi_reduction <add>, %56, %cst_33 [1, 2] : vector<1x2x128xf32> to vector<1xf32>
    %58 = vector.shape_cast %57 : vector<1xf32> to vector<1x1x1xf32>
    %59 = vector.extract %58[0, 0, 0] : f32 from vector<1x1x1xf32>
    %cst_34 = arith.constant 0.000000e+00 : f32
    %60 = arith.addf %cst_34, %59 : f32
    %61 = vector.shape_cast %55 : vector<2x128xf32> to vector<1x2x128xf32>
    %cst_35 = arith.constant dense<0.000000e+00> : vector<1xf32>
    %62 = vector.multi_reduction <add>, %61, %cst_35 [1, 2] : vector<1x2x128xf32> to vector<1xf32>
    %63 = vector.shape_cast %62 : vector<1xf32> to vector<1x1x1xf32>
    %64 = vector.extract %63[0, 0, 0] : f32 from vector<1x1x1xf32>
    %cst_36 = arith.constant 0.000000e+00 : f32
    %65 = arith.addf %cst_36, %64 : f32
    %66 = vector.broadcast %60 : f32 to vector<1x1x1x1xf32>
    %c0_37 = arith.constant 0 : index
    %c0_38 = arith.constant 0 : index
    %c0_39 = arith.constant 0 : index
    %c0_40 = arith.constant 0 : index
    %67 = vector.load %arg4[%c0_37, %c0_38, %c0_39, %c0_40] : memref<1x1x1x1xf32, #tpu.memory_space<vmem>>, vector<1x1x1x1xf32>
    tpu.vector_store %arg4[%c0_37, %c0_38, %c0_39, %c0_40], %66 {strides = array<i32>} : memref<1x1x1x1xf32, #tpu.memory_space<vmem>>, vector<1x1x1x1xf32>,
    %68 = vector.broadcast %65 : f32 to vector<1x1x1x1xf32>
    %c0_41 = arith.constant 0 : index
    %c0_42 = arith.constant 0 : index
    %c0_43 = arith.constant 0 : index
    %c0_44 = arith.constant 0 : index
    %69 = vector.load %arg5[%c0_41, %c0_42, %c0_43, %c0_44] : memref<1x1x1x1xf32, #tpu.memory_space<vmem>>, vector<1x1x1x1xf32>
    tpu.vector_store %arg5[%c0_41, %c0_42, %c0_43, %c0_44], %68 {strides = array<i32>} : memref<1x1x1x1xf32, #tpu.memory_space<vmem>>, vector<1x1x1x1xf32>,
    return
  }
  func.func @transform_0(%arg0: i32, %arg1: i32) -> (i32, i32, i32, i32) {
    %c0_i32 = arith.constant 0 : i32
    %c0_i32_0 = arith.constant 0 : i32
    %c0_i32_1 = arith.constant 0 : i32
    return %arg0, %c0_i32, %arg1, %c0_i32_0 : i32, i32, i32, i32
  }
  func.func @transform_1(%arg0: i32, %arg1: i32) -> (i32, i32, i32) {
    %c0_i32 = arith.constant 0 : i32
    %c0_i32_0 = arith.constant 0 : i32
    return %arg0, %arg1, %c0_i32 : i32, i32, i32
  }
  func.func @transform_2(%arg0: i32, %arg1: i32) -> (i32, i32, i32, i32) {
    %c0_i32 = arith.constant 0 : i32
    %c0_i32_0 = arith.constant 0 : i32
    %c0_i32_1 = arith.constant 0 : i32
    return %arg0, %arg1, %c0_i32, %c0_i32_0 : i32, i32, i32, i32
  }
  func.func @transform_3(%arg0: i32, %arg1: i32) -> (i32, i32, i32, i32) {
    %c0_i32 = arith.constant 0 : i32
    %c0_i32_0 = arith.constant 0 : i32
    %c0_i32_1 = arith.constant 0 : i32
    return %arg0, %arg1, %c0_i32, %c0_i32_0 : i32, i32, i32, i32
  }
}

</mosaic_0001>

<bundles_post_ra>
// kernel: cross_entropy_loss_2d.1
= control target key start
LH: loop header
LB: loop body
LE: loop exit
PB: predicated region body
PF: predicated region fallthrough
CT: control target
= control target key end

     0   :  { %s534_s12 = smov 0   ;;  %s536_s13 = smov 0   ;;  %s579_s0 = inlined_call_operand.vmem [shape: f32[2,4,2,128], index: 0, kind: input, shape index: {}]   ;;  %s580_s1 = inlined_call_operand.vmem [shape: s32[2,2,128], index: 1, kind: input, shape index: {}]   ;;  %s581_s2 = inlined_call_operand.vmem [shape: f32[2,1,1,1], index: 2, kind: output, shape index: {0}]   ;;  %s582_s3 = inlined_call_operand.vmem [shape: f32[2,1,1,1], index: 3, kind: output, shape index: {1}]  }
   0x1   :  { %s538_s14 = smov 0  }
   0x2 LB: > { %s26_s15 = sadd.s32 1, %s507_s13  ;;  %p439_p0 = scmp.ge.s32.totalorder %s511_s14, 1  ;;  %s511_s14 = sphi %s538_s14, %s14_s14   ;;  %s507_s13 = sphi %s536_s13, %s584_s13   ;;  %s503_s12 = sphi %s534_s12, %s583_s12  }
   0x3   : > { %p28_p1 = scmp.ge.s32.totalorder %s26_s15, 2  ;;  %p175_p2 = scmp.lt.s32.totalorder %s511_s14, 3 }
   0x5   : > { %s586_s15 = smov (%p28_p1, %s26_s15), 0  ;;  %p176_p3 = pnand %p439_p0, %p175_p2 }
   0x6   : > { %p216_p4 = scmp.lt.s32.totalorder (!%p176_p3), %s503_s12, 1  ;;  %vm286_vm5 = vcmask (!%p176_p3), 1041408   ;;  %v513_v32 = vmov (!%p176_p3), 0.0   ;;  %vm310_vm6 = vcmask (!%p176_p3), 0  }
   0x7   : > { %179 = sbr.rel (%p176_p3) target bundleno = 275 (0x113), region = 28 }
   0xe   : > { %s588_s12 = smov (!%p216_p4, %s503_s12), 1 }
   0xf   : > { %s449_s16 = sshll.u32 %s588_s12, 3  ;;  %s442_s20 = sshll.u32 %s588_s12, 1 }
  0x10   : > { %s223_s19 = scalar_lea.vmem %s579_s0, %s449_s16  ;;  %s230_s23 = scalar_lea.vmem %s580_s1, %s442_s20 }
  0x11   : > { %v244_v0 = vld [vmem:[%s223_s19] sm:$0x3]  ;;  %v443_v1 = vld [vmem:[%s223_s19 + $0x2] sm:$0x3]  ;;  %v444_v3 = vld [vmem:[%s223_s19 + $0x4] sm:$0x3]  ;;  %s236_s26 = scalar_lea.vmem %s581_s2, %s588_s12  ;;  %s242_s30 = scalar_lea.vmem %s582_s3, %s588_s12 }
  0x12   : > { %v247_v2 = vmax.f32 %v244_v0, %v443_v1  ;;  %v445_v4 = vld [vmem:[%s223_s19 + $0x6] sm:$0x3]  ;;  %v243_v21 = vld [vmem:[%s230_s23] sm:$0x3] }
  0x13   : > { %vm258_vm0 = vcmp.eq.s32.totalorder %v243_v21, 0  ;;  %vm264_vm1 = vcmp.eq.s32.totalorder %v243_v21, 1  ;;  %vm270_vm2 = vcmp.eq.s32.totalorder %v243_v21, 2  ;;  %vm276_vm3 = vcmp.eq.s32.totalorder %v243_v21, 3 }
  0x14   : > { %v250_v5 = vmax.f32 %v247_v2, %v444_v3  ;;  %v259_v23 = vsel %vm258_vm0, %v244_v0, 0.0  ;;  %vm281_vm4 = vcmp.ne.s32.totalorder %v243_v21, 4294967196 }
  0x15   : > { %v265_v24 = vsel %vm264_vm1, %v443_v1, %v259_v23  ;;  %v446_v33 = vsel %vm281_vm4, 1.0, %v513_v32 }
  0x16   : > { %v253_v6 = vmax.f32 %v250_v5, %v445_v4  ;;  %v271_v25 = vsel %vm270_vm2, %v444_v3, %v265_v24  ;;  %v298_v35 = vsel %vm286_vm5, %v446_v33, 0.0 }
  0x17   : > { %v277_v28 = vsel %vm276_vm3, %v445_v4, %v271_v25 }
  0x18   : > { %v254_v7 = vsub.f32 %v244_v0, %v253_v6  ;;  %v260_v8 = vsub.f32 %v443_v1, %v253_v6  ;;  %v266_v9 = vsub.f32 %v444_v3, %v253_v6  ;;  %v272_v10 = vsub.f32 %v445_v4, %v253_v6 }
  0x1a   : > { %v255_v11 = vmul.f32 1.442695, %v254_v7  ;;  %v261_v12 = vmul.f32 1.442695, %v260_v8  ;;  %v267_v13 = vmul.f32 1.442695, %v266_v9 }
  0x1b   : > { %v273_v14 = vmul.f32 1.442695, %v272_v10 }
  0x1c   : > { %479 = vpow2.f32 %v255_v11 }
  0x1d   : > { %481 = vpow2.f32 %v261_v12 }
  0x1e   : > { %483 = vpow2.f32 %v267_v13 }
  0x1f   : > { %485 = vpow2.f32 %v273_v14 }
  0x26   : > { %v480_v15 = vpop.eup %479 }
  0x27   : > { %v482_v16 = vpop.eup %481 }
  0x28   : > { %v484_v17 = vpop.eup %483  ;;  %v263_v18 = vadd.f32 %v482_v16, %v480_v15 }
  0x29   : > { %v486_v19 = vpop.eup %485 }
  0x2a   : > { %v269_v20 = vadd.f32 %v484_v17, %v263_v18 }
  0x2c   : > { %v275_v22 = vadd.f32 %v486_v19, %v269_v20 }
  0x2e   : > { %487 = vlog2.f32 %v275_v22 }
  0x38   : > { %v488_v26 = vpop.eup %487 }
  0x39   : > { %v279_v27 = vmul.f32 0.6931472, %v488_v26 }
  0x3b   : > { %v280_v29 = vadd.f32 %v279_v27, %v253_v6 }
  0x3d   : > { %v282_v30 = vsub.f32 %v280_v29, %v277_v28 }
  0x3f   : > { %v283_v31 = vsel %vm281_vm4, %v282_v30, 0.0 }
  0x40   : > { %v287_v34 = vsel %vm286_vm5, %v283_v31, 0.0 }
  0x41   : > { %288 = vadd.xlane.f32.xlu0 %v287_v34 }
  0x45   : > { %299 = vadd.xlane.f32.xlu0 %v298_v35 }
  0xce   : > { %v289_v36 = vpop.xlane.xlu0 %288 }
  0xcf   : > { %v290_v37 = vrot.slane %v289_v36, 4 }
  0xd1   : > { %v291_v38 = vadd.f32 %v290_v37, %v289_v36 }
  0xd2   : > { %v300_v39 = vpop.xlane.xlu0 %299 }
  0xd3   : > { %v292_v40 = vrot.slane %v291_v38, 2  ;;  %v301_v41 = vrot.slane %v300_v39, 4 }
  0xd5   : > { %v302_v42 = vadd.f32 %v301_v41, %v300_v39  ;;  %v293_v43 = vadd.f32 %v292_v40, %v291_v38 }
  0xd7   : > { %v303_v44 = vrot.slane %v302_v42, 2  ;;  %v294_v45 = vrot.slane %v293_v43, 1 }
  0xd9   : > { %v304_v46 = vadd.f32 %v303_v44, %v302_v42  ;;  %v295_v47 = vadd.f32 %v294_v45, %v293_v43 }
  0xdb   : > { %450 = vpush %v295_v47  ;;  %v305_v48 = vrot.slane %v304_v46, 1 }
  0xdd   : > { %v306_v49 = vadd.f32 %v305_v48, %v304_v46 }
  0xdf   : > { %452 = vpush %v306_v49 }
 0x10c   : > { %s451_s27 = spop %450 }
 0x10d   : > { %v309_v50 = vstv %s451_s27 }
 0x10e   : > { %311 = vst.msk [vmem:[%s236_s26] sm:$0x1] %vm310_vm6, %v309_v50 }
 0x110   : > { %s453_s4 = spop %452 }
 0x111   : > { %v312_v51 = vstv %s453_s4 }
 0x112   : > { %313 = vst.msk [vmem:[%s242_s30] sm:$0x1] %vm310_vm6, %v312_v51 }
 0x113 PF: > { %s14_s14 = sadd.s32 1, %s511_s14   ;;  %s583_s12 = smov %s507_s13 }
 0x114   : > { %p11_p5 = scmp.ge.s32.totalorder %s14_s14, 4   ;;  %s584_s13 = smov %s586_s15 }
 0x116   :  { %13 = sbr.rel (!%p11_p5) target bundleno = 2 (0x2), region = 76 }

</bundles_post_ra>
